<compile_context>
chip_gen: v5e
topology: v5e:2x2
jax: 0.10.0
libtpu: 0.0.40
codegen_flags: <defaults>
</compile_context>

<pallas_src>
import functools

import jax
import jax.numpy as jnp
from jax.experimental import pallas as pl
from jax.experimental.pallas import tpu as pltpu


def _round_up(x, m):
    return ((x + m - 1) // m) * m


_VMEM_LIMIT = 32 * 1024 * 1024


# ----------------------------------------------------------------------------
# Kernels
# ----------------------------------------------------------------------------
def _gen_loss_kernel(z_ref, w1_ref, b1_ref, w2_ref, b2_ref,
                     wd1_ref, bd1_ref, wd2_ref, bd2_ref,
                     fake_ref, part_ref, hg_ref, hd_ref, *, tb, true_b):
    """Fused G forward + D(fake) forward + LSGAN generator-loss partial sums."""
    i = pl.program_id(0)
    j = pl.program_id(1)
    nj = pl.num_programs(1)

    @pl.when(j == 0)
    def _():
        # Generator layer 1 (independent of the F chunk): compute once per tile
        # and cache as bf16 so no per-chunk re-cast is needed.
        hg = jnp.dot(z_ref[...], w1_ref[...],
                     preferred_element_type=jnp.float32)
        hg_ref[...] = jnp.maximum(hg + b1_ref[...], 0.0).astype(jnp.bfloat16)
        hd_ref[...] = jnp.zeros_like(hd_ref)

    # Generator layer 2, F-chunk j (f32 tanh, bf16 for the downstream dot).
    fake = jnp.tanh(
        jnp.dot(hg_ref[...], w2_ref[...],
                preferred_element_type=jnp.float32) + b2_ref[...])
    fake_ref[...] = fake.astype(fake_ref.dtype)

    # Discriminator layer 1 accumulated over F chunks.
    hd_ref[...] += jnp.dot(fake.astype(jnp.bfloat16), wd1_ref[...],
                           preferred_element_type=jnp.float32)

    @pl.when(j == nj - 1)
    def _():
        hd = jnp.maximum(hd_ref[...] + bd1_ref[...], 0.0)
        # N=1 head: VPU multiply + lane reduce instead of an MXU matmul.
        d = jnp.sum(hd * wd2_ref[...], axis=-1, keepdims=True) + bd2_ref[0, 0]
        rows = jax.lax.broadcasted_iota(jnp.int32, (tb, 1), 0) + i * tb
        valid = (rows < true_b).astype(jnp.float32)
        tile_sum = jnp.sum(valid * (d - 1.0) ** 2)
        part_ref[...] = jnp.ones((1, 8, 128), jnp.float32) * tile_sum


def _dis_fused_kernel(z_ref, xr_ref, w1_ref, b1_ref, w2_ref, b2_ref,
                      wd1_ref, bd1_ref, wd2_ref, bd2_ref,
                      part_ref, hg_ref, hdr_ref, hdf_ref, *, tb, true_b):
    """G fused into D: dis loss over real + freshly generated fake tiles.

    The fake images are produced chunk-by-chunk in VMEM and consumed
    immediately, so they never touch HBM.
    """
    i = pl.program_id(0)
    j = pl.program_id(1)
    nj = pl.num_programs(1)

    @pl.when(j == 0)
    def _():
        hg = jnp.dot(z_ref[...], w1_ref[...],
                     preferred_element_type=jnp.float32)
        hg_ref[...] = jnp.maximum(hg + b1_ref[...], 0.0).astype(jnp.bfloat16)
        hdr_ref[...] = jnp.zeros_like(hdr_ref)
        hdf_ref[...] = jnp.zeros_like(hdf_ref)

    fake = jnp.tanh(
        jnp.dot(hg_ref[...], w2_ref[...],
                preferred_element_type=jnp.float32) + b2_ref[...])

    hdf_ref[...] += jnp.dot(fake.astype(jnp.bfloat16), wd1_ref[...],
                            preferred_element_type=jnp.float32)
    hdr_ref[...] += jnp.dot(xr_ref[...], wd1_ref[...],
                            preferred_element_type=jnp.float32)

    @pl.when(j == nj - 1)
    def _():
        hr = jnp.maximum(hdr_ref[...] + bd1_ref[...], 0.0)
        hf = jnp.maximum(hdf_ref[...] + bd1_ref[...], 0.0)
        d_r = jnp.sum(hr * wd2_ref[...], axis=-1, keepdims=True) + bd2_ref[0, 0]
        d_f = jnp.sum(hf * wd2_ref[...], axis=-1, keepdims=True) + bd2_ref[0, 0]
        rows = jax.lax.broadcasted_iota(jnp.int32, (tb, 1), 0) + i * tb
        valid = (rows < true_b).astype(jnp.float32)
        tile_sum = jnp.sum(valid * ((d_r - 1.0) ** 2 + d_f * d_f))
        part_ref[...] = jnp.ones((1, 8, 128), jnp.float32) * tile_sum


def _dis_reuse_kernel(xr_ref, xf_ref, wd1_ref, bd1_ref, wd2_ref, bd2_ref,
                      part_ref, hdr_ref, hdf_ref, *, tb, true_b):
    """D pass over pre-computed real + fake tiles (reuse path, no G)."""
    i = pl.program_id(0)
    j = pl.program_id(1)
    nj = pl.num_programs(1)

    @pl.when(j == 0)
    def _():
        hdr_ref[...] = jnp.zeros_like(hdr_ref)
        hdf_ref[...] = jnp.zeros_like(hdf_ref)

    hdr_ref[...] += jnp.dot(xr_ref[...], wd1_ref[...],
                            preferred_element_type=jnp.float32)
    hdf_ref[...] += jnp.dot(xf_ref[...], wd1_ref[...],
                            preferred_element_type=jnp.float32)

    @pl.when(j == nj - 1)
    def _():
        hr = jnp.maximum(hdr_ref[...] + bd1_ref[...], 0.0)
        hf = jnp.maximum(hdf_ref[...] + bd1_ref[...], 0.0)
        d_r = jnp.sum(hr * wd2_ref[...], axis=-1, keepdims=True) + bd2_ref[0, 0]
        d_f = jnp.sum(hf * wd2_ref[...], axis=-1, keepdims=True) + bd2_ref[0, 0]
        rows = jax.lax.broadcasted_iota(jnp.int32, (tb, 1), 0) + i * tb
        valid = (rows < true_b).astype(jnp.float32)
        tile_sum = jnp.sum(valid * ((d_r - 1.0) ** 2 + d_f * d_f))
        part_ref[...] = jnp.ones((1, 8, 128), jnp.float32) * tile_sum


# ----------------------------------------------------------------------------
# SDGAN wrapper (parameters + forward dispatch, mirroring the PyTorch module)
# ----------------------------------------------------------------------------
class SDGAN:
    def __init__(self, hyperparameters, key):
        self.hyperparameters = hyperparameters
        self.noise_dim = hyperparameters['noise_dim']
        C = hyperparameters['image_channels']
        H = hyperparameters['image_size']
        Hd = hyperparameters['hidden_dim']
        Z = self.noise_dim
        F = C * H * H
        self.img_shape = (C, H, H)
        self.F = F

        # Hardware-aligned (zero-padded) dims — padding is numerically exact.
        self.Zp = _round_up(Z, 128)
        self.Hp = _round_up(Hd, 128)
        self.TF = min(512, _round_up(F, 128))
        self.F_pad = _round_up(F, self.TF)

        def pad2(a, r, c):
            return jnp.pad(a, ((0, r - a.shape[0]), (0, c - a.shape[1])))

        ks = jax.random.split(key, 4)
        s = 0.02
        # Generator (self.gen in the PyTorch module) — bf16 weights, f32 biases.
        self.w1 = pad2(s * jax.random.normal(ks[0], (Z, Hd), jnp.float32),
                       self.Zp, self.Hp).astype(jnp.bfloat16)
        self.b1 = jnp.zeros((1, self.Hp), jnp.float32)
        self.w2 = pad2(s * jax.random.normal(ks[1], (Hd, F), jnp.float32),
                       self.Hp, self.F_pad).astype(jnp.bfloat16)
        self.b2 = jnp.zeros((1, self.F_pad), jnp.float32)
        # Discriminator (used inside gen_losses / dis_losses).
        self.wd1 = pad2(s * jax.random.normal(ks[2], (F, Hd), jnp.float32),
                        self.F_pad, self.Hp).astype(jnp.bfloat16)
        self.bd1 = jnp.zeros((1, self.Hp), jnp.float32)
        self.wd2 = pad2(s * jax.random.normal(ks[3], (Hd, 1), jnp.float32).T,
                        1, self.Hp)                           # (1, Hp) f32 row
        self.bd2 = jnp.zeros((1, 1), jnp.float32)

        self._cparams = pltpu.CompilerParams(
            dimension_semantics=("parallel", "arbitrary"),
            vmem_limit_bytes=_VMEM_LIMIT,
        )

    # ---- internal helpers -------------------------------------------------
    def _batch_tiling(self, B):
        TB = min(128, _round_up(B, 16))
        B_pad = _round_up(B, TB)
        return TB, B_pad, B_pad // TB

    def _pad_z(self, z, B_pad):
        return jnp.pad(z.astype(jnp.float32),
                       ((0, B_pad - z.shape[0]),
                        (0, self.Zp - z.shape[1]))).astype(jnp.bfloat16)

    def _pad_img(self, a_flat, B_pad):
        B = a_flat.shape[0]
        return jnp.pad(a_flat.astype(jnp.float32),
                       ((0, B_pad - B),
                        (0, self.F_pad - self.F))).astype(jnp.bfloat16)

    # ---- losses (hot paths) ------------------------------------------------
    def gen_losses(self, z):
        B = z.shape[0]
        TB, B_pad, NB = self._batch_tiling(B)
        NF = self.F_pad // self.TF
        z_p = self._pad_z(z, B_pad)

        kernel = functools.partial(_gen_loss_kernel, tb=TB, true_b=B)
        fake_p, partials = pl.pallas_call(
            kernel,
            out_shape=(
                jax.ShapeDtypeStruct((B_pad, self.F_pad), jnp.float32),
                jax.ShapeDtypeStruct((NB, 8, 128), jnp.float32),
            ),
            grid_spec=pltpu.PrefetchScalarGridSpec(
                num_scalar_prefetch=0,
                grid=(NB, NF),
                in_specs=[
                    pl.BlockSpec((TB, self.Zp), lambda i, j: (i, 0)),
                    pl.BlockSpec((self.Zp, self.Hp), lambda i, j: (0, 0)),
                    pl.BlockSpec((1, self.Hp), lambda i, j: (0, 0)),
                    pl.BlockSpec((self.Hp, self.TF), lambda i, j: (0, j)),
                    pl.BlockSpec((1, self.TF), lambda i, j: (0, j)),
                    pl.BlockSpec((self.TF, self.Hp), lambda i, j: (j, 0)),
                    pl.BlockSpec((1, self.Hp), lambda i, j: (0, 0)),
                    pl.BlockSpec((1, self.Hp), lambda i, j: (0, 0)),
                    pl.BlockSpec(memory_space=pltpu.MemorySpace.SMEM),
                ],
                out_specs=(
                    pl.BlockSpec((TB, self.TF), lambda i, j: (i, j)),
                    pl.BlockSpec((1, 8, 128), lambda i, j: (i, 0, 0)),
                ),
                scratch_shapes=[
                    pltpu.VMEM((TB, self.Hp), jnp.bfloat16),  # G hidden (cached)
                    pltpu.VMEM((TB, self.Hp), jnp.float32),   # D hidden accumulator
                ],
            ),
            compiler_params=self._cparams,
        )(z_p, self.w1, self.b1, self.w2, self.b2,
          self.wd1, self.bd1, self.wd2, self.bd2)

        loss = jnp.sum(partials[:, 0, 0]) / float(B)
        fake = fake_p[:B, :self.F].reshape((B,) + self.img_shape)
        return loss, fake

    def dis_losses(self, z, x_real, fake=None):
        B = z.shape[0]
        TB, B_pad, NB = self._batch_tiling(B)
        NF = self.F_pad // self.TF
        x_p = self._pad_img(x_real.reshape(B, self.F), B_pad)

        if fake is None:
            # Fused path: generator runs inside the dis kernel; fake images are
            # produced chunk-by-chunk in VMEM and never materialized in HBM.
            z_p = self._pad_z(z, B_pad)
            kernel = functools.partial(_dis_fused_kernel, tb=TB, true_b=B)
            partials = pl.pallas_call(
                kernel,
                out_shape=jax.ShapeDtypeStruct((NB, 8, 128), jnp.float32),
                grid_spec=pltpu.PrefetchScalarGridSpec(
                    num_scalar_prefetch=0,
                    grid=(NB, NF),
                    in_specs=[
                        pl.BlockSpec((TB, self.Zp), lambda i, j: (i, 0)),
                        pl.BlockSpec((TB, self.TF), lambda i, j: (i, j)),
                        pl.BlockSpec((self.Zp, self.Hp), lambda i, j: (0, 0)),
                        pl.BlockSpec((1, self.Hp), lambda i, j: (0, 0)),
                        pl.BlockSpec((self.Hp, self.TF), lambda i, j: (0, j)),
                        pl.BlockSpec((1, self.TF), lambda i, j: (0, j)),
                        pl.BlockSpec((self.TF, self.Hp), lambda i, j: (j, 0)),
                        pl.BlockSpec((1, self.Hp), lambda i, j: (0, 0)),
                        pl.BlockSpec((1, self.Hp), lambda i, j: (0, 0)),
                        pl.BlockSpec(memory_space=pltpu.MemorySpace.SMEM),
                    ],
                    out_specs=pl.BlockSpec((1, 8, 128), lambda i, j: (i, 0, 0)),
                    scratch_shapes=[
                        pltpu.VMEM((TB, self.Hp), jnp.bfloat16),  # G hidden
                        pltpu.VMEM((TB, self.Hp), jnp.float32),   # D hidden (real)
                        pltpu.VMEM((TB, self.Hp), jnp.float32),   # D hidden (fake)
                    ],
                ),
                compiler_params=self._cparams,
            )(z_p, x_p, self.w1, self.b1, self.w2, self.b2,
              self.wd1, self.bd1, self.wd2, self.bd2)
        else:
            # Reuse path: fake images from gen_losses (stop-gradient'ed by the
            # training loop) — skips the generator entirely.
            f_p = self._pad_img(fake.reshape(B, self.F), B_pad)
            kernel = functools.partial(_dis_reuse_kernel, tb=TB, true_b=B)
            partials = pl.pallas_call(
                kernel,
                out_shape=jax.ShapeDtypeStruct((NB, 8, 128), jnp.float32),
                grid_spec=pltpu.PrefetchScalarGridSpec(
                    num_scalar_prefetch=0,
                    grid=(NB, NF),
                    in_specs=[
                        pl.BlockSpec((TB, self.TF), lambda i, j: (i, j)),
                        pl.BlockSpec((TB, self.TF), lambda i, j: (i, j)),
                        pl.BlockSpec((self.TF, self.Hp), lambda i, j: (j, 0)),
                        pl.BlockSpec((1, self.Hp), lambda i, j: (0, 0)),
                        pl.BlockSpec((1, self.Hp), lambda i, j: (0, 0)),
                        pl.BlockSpec(memory_space=pltpu.MemorySpace.SMEM),
                    ],
                    out_specs=pl.BlockSpec((1, 8, 128), lambda i, j: (i, 0, 0)),
                    scratch_shapes=[
                        pltpu.VMEM((TB, self.Hp), jnp.float32),
                        pltpu.VMEM((TB, self.Hp), jnp.float32),
                    ],
                ),
                compiler_params=self._cparams,
            )(x_p, f_p, self.wd1, self.bd1, self.wd2, self.bd2)

        # 0.5 * (mean_real (d-1)^2 + mean_fake d^2) == sum over both / (2B)
        loss = jnp.sum(partials[:, 0, 0]) / float(2 * B)
        return loss

    # ---- dispatching forward, exactly like the PyTorch module ----
    def forward(self, args, mode):
        if mode == 'gen':
            f = self.gen_losses(*args)
            return f
        elif mode == 'dis':
            return self.dis_losses(*args)
        else:
            pass


# ----------------------------------------------------------------------------
# Smoke test
# ----------------------------------------------------------------------------
if __name__ == "__main__":
    hyperparameters = {
        'noise_dim': 8,
        'image_channels': 4,
        'image_size': 16,
        'hidden_dim': 32,
    }
    key = jax.random.PRNGKey(0)
    k_model, k_z, k_x = jax.random.split(key, 3)

    model = SDGAN(hyperparameters, k_model)

    B = 2
    z = jax.random.normal(k_z, (B, hyperparameters['noise_dim']), jnp.float32)
    x_real = jax.random.normal(
        k_x,
        (B, hyperparameters['image_channels'],
         hyperparameters['image_size'], hyperparameters['image_size']),
        jnp.float32,
    )

    gen_loss, fake_imgs = model.forward((z,), 'gen')
    dis_loss = model.forward((z, x_real), 'dis')
    # Reuse path (no generator recompute in the dis step).
    dis_loss_reuse = model.dis_losses(z, x_real, fake=fake_imgs)

    jax.block_until_ready((gen_loss, fake_imgs, dis_loss, dis_loss_reuse))

    assert fake_imgs.shape == x_real.shape
    assert jnp.isfinite(gen_loss) and jnp.isfinite(dis_loss)
    assert jnp.allclose(dis_loss, dis_loss_reuse, atol=1e-5)
    print("KERNEL_OK")
</pallas_src>

<mosaic_0001>
module attributes {stable_mosaic.version = 11 : i64} {
  func.func @_gen_loss_kernel(%arg0: i32, %arg1: i32, %arg2: memref<16x128xbf16, #tpu.memory_space<vmem>>, %arg3: memref<128x128xbf16, #tpu.memory_space<vmem>>, %arg4: memref<1x128xf32, #tpu.memory_space<vmem>>, %arg5: memref<128x512xbf16, #tpu.memory_space<vmem>>, %arg6: memref<1x512xf32, #tpu.memory_space<vmem>>, %arg7: memref<512x128xbf16, #tpu.memory_space<vmem>>, %arg8: memref<1x128xf32, #tpu.memory_space<vmem>>, %arg9: memref<1x128xf32, #tpu.memory_space<vmem>>, %arg10: memref<1x1xf32, #tpu.memory_space<smem>>, %arg11: memref<16x512xf32, #tpu.memory_space<vmem>>, %arg12: memref<1x8x128xf32, #tpu.memory_space<vmem>>, %arg13: memref<16x128xbf16, #tpu.memory_space<vmem>>, %arg14: memref<16x128xf32, #tpu.memory_space<vmem>>) attributes {dimension_semantics = [#tpu.dimension_semantics<parallel>, #tpu.dimension_semantics<arbitrary>], iteration_bounds = array<i64: 1, 2>, scalar_prefetch = 0 : i64, scratch_operands = 2 : i64, tpu.core_type = #tpu.core_type<tc>, window_params = [{transform_indices = @transform_0, window_bounds = array<i64: 16, 128>}, {pipeline_mode = #tpu.pipeline_mode<synchronous>, transform_indices = @transform_1, window_bounds = array<i64: 128, 128>}, {pipeline_mode = #tpu.pipeline_mode<synchronous>, transform_indices = @transform_2, window_bounds = array<i64: 1, 128>}, {transform_indices = @transform_3, window_bounds = array<i64: 128, 512>}, {transform_indices = @transform_4, window_bounds = array<i64: 1, 512>}, {transform_indices = @transform_5, window_bounds = array<i64: 512, 128>}, {pipeline_mode = #tpu.pipeline_mode<synchronous>, transform_indices = @transform_6, window_bounds = array<i64: 1, 128>}, {pipeline_mode = #tpu.pipeline_mode<synchronous>, transform_indices = @transform_7, window_bounds = array<i64: 1, 128>}, {transform_indices = @transform_8, window_bounds = array<i64: 1, 1>}, {transform_indices = @transform_9, window_bounds = array<i64: 16, 512>}, {transform_indices = @transform_10, window_bounds = array<i64: 1, 8, 128>}]} {
    %c0_i32 = arith.constant 0 : i32
    %0 = arith.cmpi eq, %arg1, %c0_i32 : i32
    %1 = arith.extui %0 : i1 to i32
    %c0_i32_0 = arith.constant 0 : i32
    %2 = arith.cmpi ne, %1, %c0_i32_0 : i32
    scf.if %2 {
      %c0_16 = arith.constant 0 : index
      %c0_17 = arith.constant 0 : index
      %20 = vector.load %arg2[%c0_16, %c0_17] : memref<16x128xbf16, #tpu.memory_space<vmem>>, vector<16x128xbf16>
      %c0_18 = arith.constant 0 : index
      %c0_19 = arith.constant 0 : index
      %21 = vector.load %arg3[%c0_18, %c0_19] : memref<128x128xbf16, #tpu.memory_space<vmem>>, vector<128x128xbf16>
      %cst_20 = arith.constant dense<0.000000e+00> : vector<16x128xf32>
      %22 = tpu.matmul %20, %21, %cst_20 {dimension_numbers = #tpu.dot_dimension_numbers<[1], [0], [0], [1], [0, 0, 1, 1], [], []>} : vector<16x128xbf16>, vector<128x128xbf16>, vector<16x128xf32> -> vector<16x128xf32>
      %c0_21 = arith.constant 0 : index
      %c0_22 = arith.constant 0 : index
      %23 = vector.load %arg4[%c0_21, %c0_22] : memref<1x128xf32, #tpu.memory_space<vmem>>, vector<1x128xf32>
      %24 = vector.broadcast %23 : vector<1x128xf32> to vector<16x128xf32>
      %25 = arith.addf %22, %24 : vector<16x128xf32>
      %cst_23 = arith.constant 0.000000e+00 : f32
      %26 = vector.broadcast %cst_23 : f32 to vector<16x128xf32>
      %27 = arith.maximumf %25, %26 : vector<16x128xf32>
      %28 = arith.truncf %27 : vector<16x128xf32> to vector<16x128xbf16>
      %c0_24 = arith.constant 0 : index
      %c0_25 = arith.constant 0 : index
      %29 = vector.load %arg13[%c0_24, %c0_25] : memref<16x128xbf16, #tpu.memory_space<vmem>>, vector<16x128xbf16>
      tpu.vector_store %arg13[%c0_24, %c0_25], %28 {strides = array<i32>} : memref<16x128xbf16, #tpu.memory_space<vmem>>, vector<16x128xbf16>,
      %cst_26 = arith.constant 0.000000e+00 : f32
      %30 = vector.broadcast %cst_26 : f32 to vector<16x128xf32>
      %c0_27 = arith.constant 0 : index
      %c0_28 = arith.constant 0 : index
      %31 = vector.load %arg14[%c0_27, %c0_28] : memref<16x128xf32, #tpu.memory_space<vmem>>, vector<16x128xf32>
      tpu.vector_store %arg14[%c0_27, %c0_28], %30 {strides = array<i32>} : memref<16x128xf32, #tpu.memory_space<vmem>>, vector<16x128xf32>,
    } else {
    }
    %c0 = arith.constant 0 : index
    %c0_1 = arith.constant 0 : index
    %3 = vector.load %arg13[%c0, %c0_1] : memref<16x128xbf16, #tpu.memory_space<vmem>>, vector<16x128xbf16>
    %c0_2 = arith.constant 0 : index
    %c0_3 = arith.constant 0 : index
    %4 = vector.load %arg5[%c0_2, %c0_3] : memref<128x512xbf16, #tpu.memory_space<vmem>>, vector<128x512xbf16>
    %cst = arith.constant dense<0.000000e+00> : vector<16x512xf32>
    %5 = tpu.matmul %3, %4, %cst {dimension_numbers = #tpu.dot_dimension_numbers<[1], [0], [0], [1], [0, 0, 1, 1], [], []>} : vector<16x128xbf16>, vector<128x512xbf16>, vector<16x512xf32> -> vector<16x512xf32>
    %c0_4 = arith.constant 0 : index
    %c0_5 = arith.constant 0 : index
    %6 = vector.load %arg6[%c0_4, %c0_5] : memref<1x512xf32, #tpu.memory_space<vmem>>, vector<1x512xf32>
    %7 = vector.broadcast %6 : vector<1x512xf32> to vector<16x512xf32>
    %8 = arith.addf %5, %7 : vector<16x512xf32>
    %9 = math.tanh %8 : vector<16x512xf32>
    %c0_6 = arith.constant 0 : index
    %c0_7 = arith.constant 0 : index
    %10 = vector.load %arg11[%c0_6, %c0_7] : memref<16x512xf32, #tpu.memory_space<vmem>>, vector<16x512xf32>
    tpu.vector_store %arg11[%c0_6, %c0_7], %9 {strides = array<i32>} : memref<16x512xf32, #tpu.memory_space<vmem>>, vector<16x512xf32>,
    %c0_8 = arith.constant 0 : index
    %c0_9 = arith.constant 0 : index
    %11 = vector.load %arg14[%c0_8, %c0_9] : memref<16x128xf32, #tpu.memory_space<vmem>>, vector<16x128xf32>
    %12 = arith.truncf %9 : vector<16x512xf32> to vector<16x512xbf16>
    %c0_10 = arith.constant 0 : index
    %c0_11 = arith.constant 0 : index
    %13 = vector.load %arg7[%c0_10, %c0_11] : memref<512x128xbf16, #tpu.memory_space<vmem>>, vector<512x128xbf16>
    %cst_12 = arith.constant dense<0.000000e+00> : vector<16x128xf32>
    %14 = tpu.matmul %12, %13, %cst_12 {dimension_numbers = #tpu.dot_dimension_numbers<[1], [0], [0], [1], [0, 0, 1, 1], [], []>} : vector<16x512xbf16>, vector<512x128xbf16>, vector<16x128xf32> -> vector<16x128xf32>
    %15 = arith.addf %11, %14 : vector<16x128xf32>
    %c0_13 = arith.constant 0 : index
    %c0_14 = arith.constant 0 : index
    %16 = vector.load %arg14[%c0_13, %c0_14] : memref<16x128xf32, #tpu.memory_space<vmem>>, vector<16x128xf32>
    tpu.vector_store %arg14[%c0_13, %c0_14], %15 {strides = array<i32>} : memref<16x128xf32, #tpu.memory_space<vmem>>, vector<16x128xf32>,
    %c1_i32 = arith.constant 1 : i32
    %17 = arith.cmpi eq, %arg1, %c1_i32 : i32
    %18 = arith.extui %17 : i1 to i32
    %c0_i32_15 = arith.constant 0 : i32
    %19 = arith.cmpi ne, %18, %c0_i32_15 : i32
    scf.if %19 {
      %c0_16 = arith.constant 0 : index
      %c0_17 = arith.constant 0 : index
      %20 = vector.load %arg14[%c0_16, %c0_17] : memref<16x128xf32, #tpu.memory_space<vmem>>, vector<16x128xf32>
      %c0_18 = arith.constant 0 : index
      %c0_19 = arith.constant 0 : index
      %21 = vector.load %arg8[%c0_18, %c0_19] : memref<1x128xf32, #tpu.memory_space<vmem>>, vector<1x128xf32>
      %22 = vector.broadcast %21 : vector<1x128xf32> to vector<16x128xf32>
      %23 = arith.addf %20, %22 : vector<16x128xf32>
      %cst_20 = arith.constant 0.000000e+00 : f32
      %24 = vector.broadcast %cst_20 : f32 to vector<16x128xf32>
      %25 = arith.maximumf %23, %24 : vector<16x128xf32>
      %c0_21 = arith.constant 0 : index
      %c0_22 = arith.constant 0 : index
      %26 = vector.load %arg9[%c0_21, %c0_22] : memref<1x128xf32, #tpu.memory_space<vmem>>, vector<1x128xf32>
      %27 = vector.broadcast %26 : vector<1x128xf32> to vector<16x128xf32>
      %28 = arith.mulf %25, %27 : vector<16x128xf32>
      %cst_23 = arith.constant dense<0.000000e+00> : vector<16xf32>
      %29 = vector.multi_reduction <add>, %28, %cst_23 [1] : vector<16x128xf32> to vector<16xf32>
      %30 = vector.shape_cast %29 : vector<16xf32> to vector<16x1xf32>
      %c0_24 = arith.constant 0 : index
      %c0_25 = arith.constant 0 : index
      %31 = memref.load %arg10[%c0_24, %c0_25] : memref<1x1xf32, #tpu.memory_space<smem>>
      %32 = vector.broadcast %31 : f32 to vector<16x1xf32>
      %33 = arith.addf %30, %32 : vector<16x1xf32>
      %34 = tpu.iota {dimensions = array<i32: 0>} : vector<16x1xi32>
      %c16_i32 = arith.constant 16 : i32
      %35 = arith.muli %arg0, %c16_i32 : i32
      %36 = vector.broadcast %35 : i32 to vector<16x1xi32>
      %37 = arith.addi %34, %36 : vector<16x1xi32>
      %c2_i32 = arith.constant 2 : i32
      %38 = vector.broadcast %c2_i32 : i32 to vector<16x1xi32>
      %39 = arith.cmpi slt, %37, %38 : vector<16x1xi32>
      %40 = arith.extui %39 : vector<16x1xi1> to vector<16x1xi32>
      %41 = arith.sitofp %40 : vector<16x1xi32> to vector<16x1xf32>
      %cst_26 = arith.constant 1.000000e+00 : f32
      %42 = vector.broadcast %cst_26 : f32 to vector<16x1xf32>
      %43 = arith.subf %33, %42 : vector<16x1xf32>
      %44 = arith.mulf %43, %43 : vector<16x1xf32>
      %45 = arith.mulf %41, %44 : vector<16x1xf32>
      %46 = vector.shape_cast %45 : vector<16x1xf32> to vector<1x16x1xf32>
      %cst_27 = arith.constant dense<0.000000e+00> : vector<1xf32>
      %47 = vector.multi_reduction <add>, %46, %cst_27 [1, 2] : vector<1x16x1xf32> to vector<1xf32>
      %48 = vector.shape_cast %47 : vector<1xf32> to vector<1x1x1xf32>
      %49 = vector.extract %48[0, 0, 0] : f32 from vector<1x1x1xf32>
      %cst_28 = arith.constant 1.000000e+00 : f32
      %50 = vector.broadcast %cst_28 : f32 to vector<1x8x128xf32>
      %51 = vector.broadcast %49 : f32 to vector<1x8x128xf32>
      %52 = arith.mulf %50, %51 : vector<1x8x128xf32>
      %c0_29 = arith.constant 0 : index
      %c0_30 = arith.constant 0 : index
      %c0_31 = arith.constant 0 : index
      %53 = vector.load %arg12[%c0_29, %c0_30, %c0_31] : memref<1x8x128xf32, #tpu.memory_space<vmem>>, vector<1x8x128xf32>
      tpu.vector_store %arg12[%c0_29, %c0_30, %c0_31], %52 {strides = array<i32>} : memref<1x8x128xf32, #tpu.memory_space<vmem>>, vector<1x8x128xf32>,
    } else {
    }
    return
  }
  func.func @transform_0(%arg0: i32, %arg1: i32) -> (i32, i32) {
    %c0_i32 = arith.constant 0 : i32
    %c0_i32_0 = arith.constant 0 : i32
    return %arg0, %c0_i32 : i32, i32
  }
  func.func @transform_1(%arg0: i32, %arg1: i32) -> (i32, i32) {
    %c0_i32 = arith.constant 0 : i32
    %c0_i32_0 = arith.constant 0 : i32
    %c0_i32_1 = arith.constant 0 : i32
    return %c0_i32, %c0_i32_0 : i32, i32
  }
  func.func @transform_2(%arg0: i32, %arg1: i32) -> (i32, i32) {
    %c0_i32 = arith.constant 0 : i32
    %c0_i32_0 = arith.constant 0 : i32
    %c0_i32_1 = arith.constant 0 : i32
    return %c0_i32, %c0_i32_0 : i32, i32
  }
  func.func @transform_3(%arg0: i32, %arg1: i32) -> (i32, i32) {
    %c0_i32 = arith.constant 0 : i32
    %c0_i32_0 = arith.constant 0 : i32
    return %c0_i32, %arg1 : i32, i32
  }
  func.func @transform_4(%arg0: i32, %arg1: i32) -> (i32, i32) {
    %c0_i32 = arith.constant 0 : i32
    %c0_i32_0 = arith.constant 0 : i32
    return %c0_i32, %arg1 : i32, i32
  }
  func.func @transform_5(%arg0: i32, %arg1: i32) -> (i32, i32) {
    %c0_i32 = arith.constant 0 : i32
    %c0_i32_0 = arith.constant 0 : i32
    return %arg1, %c0_i32 : i32, i32
  }
  func.func @transform_6(%arg0: i32, %arg1: i32) -> (i32, i32) {
    %c0_i32 = arith.constant 0 : i32
    %c0_i32_0 = arith.constant 0 : i32
    %c0_i32_1 = arith.constant 0 : i32
    return %c0_i32, %c0_i32_0 : i32, i32
  }
  func.func @transform_7(%arg0: i32, %arg1: i32) -> (i32, i32) {
    %c0_i32 = arith.constant 0 : i32
    %c0_i32_0 = arith.constant 0 : i32
    %c0_i32_1 = arith.constant 0 : i32
    return %c0_i32, %c0_i32_0 : i32, i32
  }
  func.func @transform_8(%arg0: i32, %arg1: i32) -> (i32, i32) {
    %c0_i32 = arith.constant 0 : i32
    %c0_i32_0 = arith.constant 0 : i32
    %c0_i32_1 = arith.constant 0 : i32
    return %c0_i32, %c0_i32_0 : i32, i32
  }
  func.func @transform_9(%arg0: i32, %arg1: i32) -> (i32, i32) {
    %c0_i32 = arith.constant 0 : i32
    return %arg0, %arg1 : i32, i32
  }
  func.func @transform_10(%arg0: i32, %arg1: i32) -> (i32, i32, i32) {
    %c0_i32 = arith.constant 0 : i32
    %c0_i32_0 = arith.constant 0 : i32
    %c0_i32_1 = arith.constant 0 : i32
    return %arg0, %c0_i32, %c0_i32_0 : i32, i32, i32
  }
}

</mosaic_0001>

<bundles_post_ra>
// kernel: tpu_custom_call.1
= control target key start
LH: loop header
LB: loop body
LE: loop exit
PB: predicated region body
PF: predicated region fallthrough
CT: control target
= control target key end

     0   :  { %s2701_s0 = inlined_call_operand.hbm [shape: bf16[16,128], index: 0, kind: input, shape index: {}]   ;;  %s2702_s1 = inlined_call_operand.hbm [shape: bf16[128,128], index: 1, kind: input, shape index: {}]   ;;  %s2703_s2 = inlined_call_operand.vmem [shape: f32[1,128], index: 2, kind: input, shape index: {}]   ;;  %s2704_s3 = inlined_call_operand.hbm [shape: bf16[128,1024], index: 3, kind: input, shape index: {}]   ;;  %s2705_s4 = inlined_call_operand.hbm [shape: f32[1,1024], index: 4, kind: input, shape index: {}]   ;;  %s2706_s5 = inlined_call_operand.hbm [shape: bf16[1024,128], index: 5, kind: input, shape index: {}]   ;;  %s2707_s6 = inlined_call_operand.vmem [shape: f32[1,128], index: 6, kind: input, shape index: {}]   ;;  %s2708_s7 = inlined_call_operand.vmem [shape: f32[1,128], index: 7, kind: input, shape index: {}]   ;;  %s2709_s8 = inlined_call_operand.<no memory space> [shape: f32[1,1], index: 8, kind: input, shape index: {}]   ;;  %s2710_s9 = inlined_call_operand.hbm [shape: f32[16,1024], index: 9, kind: output, shape index: {0}]   ;;  %s2711_s10 = inlined_call_operand.hbm [shape: f32[1,8,128], index: 10, kind: output, shape index: {1}]  }
   0x1   :  { %2725 = sst [smem:[#allocation28_spill]] %s2701_s0 }
   0x2   :  { %2726 = sst [smem:[#allocation29_spill]] %s2704_s3 }
   0x3   :  { %2727 = sst [smem:[#allocation30_spill]] %s2708_s7 }
   0x4   :  { %2728 = sst [smem:[#allocation31_spill]] %s2710_s9 }
   0x5   :  { %2729 = sst [smem:[#allocation32_spill]] %s2711_s10 }
   0x6   :  { %16 = sst [smem:[#allocation4]] %s2709_s8 }
   0x7   :  { %17 = vsyncpa [#allocation6], 0 }
   0x8   :  { %18 = vsyncpa [#allocation9], 0 }
   0x9   :  { %19 = vsyncpa [#allocation7], 0 }
   0xa   :  { %21 = vsyncpa [#allocation7 + $0x1], 0 }
   0xb   :  { %22 = vsyncpa [#allocation15], 0  ;;  %s2366_s15 = smov 0   ;;  %s2368_s16 = smov 0  }
   0xc   :  { %s2370_s17 = smov 0   ;;  %s2372_s18 = smov 0  }
   0xd   :  { %s2374_s19 = smov 0   ;;  %s2376_s20 = smov 0  }
   0xe LB: > { %2730 = sst [smem:[#allocation21_spill]] %s2273_s15  ;;  %s2397_s8 = sadd.s32 4294967295, %s2293_s20   ;;  %s2293_s20 = sphi %s2376_s20, %s28_s20   ;;  %s2289_s19 = sphi %s2374_s19, %s2763_s19   ;;  %s2285_s18 = sphi %s2372_s18, %s2762_s18   ;;  %s2281_s17 = sphi %s2370_s17, %s2758_s17   ;;  %s2277_s16 = sphi %s2368_s16, %s2761_s16   ;;  %s2273_s15 = sphi %s2366_s15, %s2760_s15  }
   0xf   : > { %2731 = sst [smem:[#allocation22_spill]] %s2281_s17  ;;  %s1480_s21 = sadd.s32 4294967294, %s2293_s20  }
  0x10   : > { %2732 = sst [smem:[#allocation23_spill]] %s2293_s20  ;;  %p122_p0 = scmp.ne.s32.totalorder %s2281_s17, %s2277_s16 }
  0x11   : > { %p123_p1 = scmp.eq.s32.totalorder %s2293_s20, 0  ;;  %p128_p2 = scmp.ne.s32.totalorder %s2277_s16, %s2273_s15 }
  0x12   : > { %p129_p3 = scmp.eq.s32.totalorder %s2397_s8, 0  ;;  %p269_p4 = scmp.eq.s32.totalorder %s2397_s8, 1 }
  0x13   : > { %p2408_p5 = por %p123_p1, %p122_p0  ;;  %p275_p6 = scmp.eq.s32.totalorder %s1480_s21, 1 }
  0x14   : > { %p2414_p7 = por %p129_p3, %p128_p2  ;;  %p2420_p8 = por %p269_p4, %p122_p0 }
  0x15   : > { %p2424_p9 = por %p275_p6, %p128_p2  ;;  %p1481_p10 = scmp.ge.s32.totalorder %s2293_s20, 1 }
  0x16   : > { %s2735_s25 = scalar_select %p2420_p8, 1, 0 }
  0x17   : > { %s2737_s26 = scalar_select %p2424_p9, 1, 0 }
  0x18   : > { %2736 = sst [smem:[#allocation24_spill]] %s2735_s25  ;;  %p308_p11 = scmp.lt.s32.totalorder %s2293_s20, 3 }
  0x19   : > { %2738 = sst [smem:[#allocation25_spill]] %s2737_s26  ;;  %s2295_s11 = smov [#allocation5]  }
  0x1a   : > { %s2739_s0 = sld [smem:[#allocation28_spill]]  ;;  %p2433_p12 = pnand %p1481_p10, %p308_p11 }
  0x1b   : > { %s324_s12 = sshll.u32 %s2295_s11, 4  ;;  %p1484_p0 = scmp.ge.s32.totalorder %s2293_s20, 2  ;;  %s325_s12 = int_to_ptr.vmem [resolvable:$true] %s324_s12 }
  0x1c   : > { %p1912_p13 = pneg %p2433_p12  ;;  %p1935_p2 = scmp.lt.s32.totalorder %s2293_s20, 2 }
  0x1d   : > { %s364_s14 = sand.u32 1, %s2293_s20   ;;  %s2717_s27 = smov 64  }
  0x1e   : > { %p2442_p1 = pnand %p1912_p13, %p129_p3  ;;  %p2450_p6 = pnand %p1935_p2, %p2408_p5 }
  0x1f   : > { %s2719_s28 = smov 4   ;;  %s37_s11 = sadd.s32 1, %s2289_s19 }
  0x20   : > { %s322_s29 = sshll.u32 %s2739_s0, 4  ;;  %p38_p10 = scmp.ge.s32.totalorder %s37_s11, 2  ;;  %s323_s29 = int_to_ptr.hbm [resolvable:$true] %s322_s29 }
  0x21   : > { %1915 = dma.hbm_to_vmem [thread:$0]  (!%p2442_p1), %s323_s29, 128, %s325_s12, [#allocation6], %s2717_s27, %s2717_s27, %s2719_s28  }
  0x22   : > { %s366_s22 = sand.u32 1, %s2281_s17   ;;  %s1808_s23 = sshll.u32 %s2289_s19, 4 }
  0x23   : > { %s2461_s0 = sshll.u32 %s366_s22, 8  ;;  %s2765_s11 = smov (%p38_p10, %s37_s11), 0 }
  0x24   : > { %2743 = sst [smem:[#allocation26_spill]] %s2765_s11  ;;  %s112_s10 = ssub.s32 %s2289_s19, %s2765_s11 }
  0x25   : > { %s2744_s3 = sld [smem:[#allocation29_spill]]  ;;  %p113_p5 = scmp.eq.s32.totalorder %s112_s10, 0 }
  0x26   : > { %s368_s29 = scalar_lea.vmem [#allocation10], %s2461_s0  ;;  %s2745_s27 = sadd.s32 1, %s2281_s17 }
  0x27   : > { %s376_s12 = sshll.u32 %s368_s29, 4  ;;  %s1488_s25 = sshll.u32 %s366_s22, 2  ;;  %s377_s12 = int_to_ptr.vmem [resolvable:$true] %s376_s12 }
  0x28   : > { %s2475_s28 = scalar_select %p113_p5, %s2281_s17, %s2745_s27  }
  0x29   : > { %s2477_s7 = scalar_lea.sflag [#allocation6], %s364_s14  ;;  %s2298_s20 = smov 512  }
  0x2a   : > { %2746 = sst [smem:[#allocation27_spill]] %s2475_s28  ;;  %s2299_s26 = smov 256  }
  0x2b   : > { %s373_s15 = scalar_lea.hbm %s2744_s3, %s1808_s23  ;;  %s2300_s23 = smov 16  }
  0x2c   : > { %s374_s9 = sshll.u32 %s373_s15, 4  ;;  %s1489_s10 = sshll.u32 %s2289_s19, 2  ;;  %s375_s9 = int_to_ptr.hbm [resolvable:$true] %s374_s9 }
  0x2d   : > { %1922 = dma.hbm_to_vmem [thread:$0]  (!%p2450_p6), %s375_s9, 4096, %s377_s12, %s2477_s7, %s2298_s20, %s2299_s26, %s2300_s23  }
  0x2e   : > { %s394_s27 = scalar_lea.hbm %s2705_s4, %s1489_s10  ;;  %s390_s3 = scalar_lea.vmem [#allocation11], %s1488_s25 }
  0x2f   : > { %s398_s11 = sshll.u32 %s390_s3, 4  ;;  %s396_s22 = sshll.u32 %s394_s27, 4  ;;  %s399_s11 = int_to_ptr.vmem [resolvable:$true] %s398_s11  ;;  %s397_s22 = int_to_ptr.hbm [resolvable:$true] %s396_s22 }
  0x30   : > { %s336_s17 = sshll.u32 %s2702_s1, 4  ;;  %s2301_s9 = smov [#allocation8]   ;;  %s337_s17 = int_to_ptr.hbm [resolvable:$true] %s336_s17 }
  0x31   : > { %1925 = dma.hbm_to_vmem [thread:$0]  (!%p2450_p6), %s397_s22, 64, %s399_s11, %s2477_s7  }
  0x32   : > { %s338_s12 = sshll.u32 %s2301_s9, 4  ;;  %s1809_s20 = sshll.u32 %s2289_s19, 8  ;;  %s339_s12 = int_to_ptr.vmem [resolvable:$true] %s338_s12 }
  0x33   : > { %s2747_s26 = smov 4   ;;  %s2748_s25 = smov 64  }
  0x34   : > { %1918 = dma.hbm_to_vmem [thread:$0]  (!%p2442_p1), %s337_s17, 1024, %s339_s12, [#allocation9], %s2748_s25, %s2748_s25, %s2747_s26  }
  0x35   : > { %s414_s10 = scalar_lea.hbm %s2706_s5, %s1809_s20  ;;  %s409_s15 = scalar_lea.vmem [#allocation12], %s2461_s0 }
  0x36   : > { %s417_s29 = sshll.u32 %s409_s15, 4  ;;  %s415_s28 = sshll.u32 %s414_s10, 4  ;;  %s418_s29 = int_to_ptr.vmem [resolvable:$true] %s417_s29  ;;  %s416_s28 = int_to_ptr.hbm [resolvable:$true] %s415_s28 }
  0x37   : > { %1928 = dma.hbm_to_vmem [thread:$0]  (!%p2450_p6), %s416_s28, 4096, %s418_s29, %s2477_s7, %s2748_s25, %s2748_s25, %s2747_s26  }
  0x38   : > { %429 = sbr.rel (%p2433_p12) target bundleno = 938 (0x3aa), region = 56 }
  0x3d   : > { %2252 = dma.done.wait (%p129_p3), [#allocation6], 128  }
  0x3e   : > { %2254 = vsyncadd (%p129_p3), [#allocation6], 4294967168 }
  0x3f   : > { %2256 = dma.done.wait (%p129_p3), [#allocation9], 1024  }
  0x40   : > { %2258 = vsyncadd (%p129_p3), [#allocation9], 4294966272  ;;  %s441_s0 = sand.u32 1, %s2397_s8   ;;  %s2520_s7 = sand.u32 1, %s2277_s16  }
  0x41   : > { %s1496_s17 = sshll.u32 %s2520_s7, 8  ;;  %s442_s30 = scalar_lea.sflag [#allocation6], %s441_s0 }
  0x42   : > { %s2523_s13 = scalar_lea.vmem [#allocation10], %s1496_s17 }
  0x43   : > { %2260 = dma.done.wait (%p2414_p7), %s442_s30, 8256  }
  0x44   : > { %2262 = vsyncadd (%p2414_p7), %s442_s30, 4294959040  ;;  %s1497_s21 = sshll.u32 %s2520_s7, 2  ;;  %s1499_s11 = sshll.u32 %s2520_s7, 6 }
  0x45   : > { %s2531_s27 = scalar_lea.vmem [#allocation11], %s1497_s21  ;;  %s2533_s22 = scalar_lea.vmem [#allocation12], %s1496_s17 }
  0x46   : > { %s2535_s14 = scalar_lea.vmem [#allocation13], %s1499_s11  ;;  %p1500_p3 = scmp.ne.s32.totalorder %s2285_s18, 0 }
  0x48   : > { %522 = sbr.rel (%p1500_p3) target bundleno = 250 (0xfa), region = 80 }
  0x4d   : > { %v1818_v0 = vld [vmem:[#allocation8 + $0x38] sm:$0xff]  ;;  %v1817_v1 = vld [vmem:[#allocation8 + $0x30] sm:$0xff]  ;;  %v1816_v2 = vld [vmem:[#allocation8 + $0x28] sm:$0xff]  ;;  %v2302_v9 = vmov 0.0  }
  0x4e   : > { %599 = vmatpush.bf16.msra.mxu0 %v1818_v0  ;;  %v1815_v3 = vld [vmem:[#allocation8 + $0x20] sm:$0xff]  ;;  %v1814_v4 = vld [vmem:[#allocation8 + $0x18] sm:$0xff]  ;;  %v1813_v5 = vld [vmem:[#allocation8 + $0x10] sm:$0xff]  ;;  %619 = vst [vmem:[#allocation3] sm:$0xff] %v2302_v9 }
  0x4f   : > { %v1812_v6 = vld [vmem:[#allocation8 + $0x8] sm:$0xff]  ;;  %v1811_v7 = vld [vmem:[#allocation8] sm:$0xff]  ;;  %v1810_v8 = vld [vmem:[#allocation5] sm:$0xff]  ;;  %620 = vst [vmem:[#allocation3 + $0x8] sm:$0xff] %v2302_v9 }
  0x50   : > { %v2002_v11 = vld [vmem:[%s2703_s2] ss:$0 sm:$0xff] }
  0x52   : > { %600 = vmatpush.bf16.msra.mxu0 %v1817_v1 }
  0x56   : > { %601 = vmatpush.bf16.msra.mxu0 %v1816_v2 }
  0x5a   : > { %602 = vmatpush.bf16.msra.mxu0 %v1815_v3 }
  0x5e   : > { %603 = vmatpush.bf16.msra.mxu0 %v1814_v4 }
  0x62   : > { %604 = vmatpush.bf16.msra.mxu0 %v1813_v5 }
  0x66   : > { %605 = vmatpush.bf16.msra.mxu0 %v1812_v6 }
  0x6a   : > { %606 = vmatpush.bf16.msra.mxu0 %v1811_v7 }
  0x6d   : > { %607 = vmatmul.bf16.vlgmr.msra.gmra.mxu0 %v1810_v8 }
  0xea   : > { %v608_v10 = vpop.f32.mrf.mxu0 }
  0xeb   : > { %v609_v12 = vadd.f32 %v2002_v11, %v608_v10 }
  0xed   : > { %v613_v15 = vmax.f32 %v609_v12, 0.0 }
  0xf2   : > { %v610_v13 = vpop.f32.mrf.mxu0 }
  0xf3   : > { %v611_v14 = vadd.f32 %v2002_v11, %v610_v13 }
  0xf5   : > { %v614_v16 = vmax.f32 %v611_v14, 0.0 }
  0xf7   : > { %v1888_v17 = vpack.c.bf16 %v614_v16, %v613_v15 }
  0xf9   : > { %1889 = vst [vmem:[#allocation2] sm:$0xff] %v1888_v17  }
  0xfa PF: > { %v1655_v18 = vld [vmem:[%s2523_s13 + $0xe0] sm:$0xf]  ;;  %v1850_v19 = vld [vmem:[%s2523_s13 + $0xec] sm:$0xf0]  ;;  %v1848_v20 = vld [vmem:[%s2523_s13 + $0xe4] sm:$0xf] }
  0xfb   : > { %v1656_v21 = vor.u32 %v1850_v19, %v1655_v18  ;;  %v1657_v22 = vld [vmem:[%s2523_s13 + $0xf0] sm:$0xf0]  ;;  %v1663_v23 = vld [vmem:[%s2523_s13 + $0xe8] sm:$0xf]  ;;  %v1851_v24 = vld [vmem:[%s2523_s13 + $0xf4] sm:$0xf0] }
  0xfc   : > { %v1660_v25 = vor.u32 %v1848_v20, %v1657_v22  ;;  %v1664_v26 = vor.u32 %v1851_v24, %v1663_v23  ;;  %v1849_v27 = vld [vmem:[%s2523_s13 + $0xec] sm:$0xf]  ;;  %v1665_v28 = vld [vmem:[%s2523_s13 + $0xf8] sm:$0xf0]  ;;  %v1639_v29 = vld [vmem:[%s2523_s13 + $0xc0] sm:$0xf] }
  0xfd   : > { %831 = vmatpush.bf16.msra.mxu0 %v1656_v21  ;;  %v1668_v30 = vor.u32 %v1849_v27, %v1665_v28  ;;  %v1846_v31 = vld [vmem:[%s2523_s13 + $0xcc] sm:$0xf0]  ;;  %v1844_v32 = vld [vmem:[%s2523_s13 + $0xc4] sm:$0xf]  ;;  %v1641_v33 = vld [vmem:[%s2523_s13 + $0xd0] sm:$0xf0] }
  0xfe   : > { %845 = vmatpush.bf16.msra.mxu1 %v1660_v25  ;;  %859 = vmatpush.bf16.msra.mxu2 %v1664_v26  ;;  %v1640_v34 = vor.u32 %v1846_v31, %v1639_v29  ;;  %v1644_v35 = vor.u32 %v1844_v32, %v1641_v33  ;;  %v1647_v36 = vld [vmem:[%s2523_s13 + $0xc8] sm:$0xf]  ;;  %v1847_v37 = vld [vmem:[%s2523_s13 + $0xd4] sm:$0xf0]  ;;  %v1845_v38 = vld [vmem:[%s2523_s13 + $0xcc] sm:$0xf] }
  0xff   : > { %873 = vmatpush.bf16.msra.mxu3 %v1668_v30  ;;  %v1648_v39 = vor.u32 %v1847_v37, %v1647_v36  ;;  %v1649_v40 = vld [vmem:[%s2523_s13 + $0xd8] sm:$0xf0]  ;;  %v1623_v41 = vld [vmem:[%s2523_s13 + $0xa0] sm:$0xf]  ;;  %v1842_v42 = vld [vmem:[%s2523_s13 + $0xac] sm:$0xf0] }
 0x100   : > { %v1652_v43 = vor.u32 %v1845_v38, %v1649_v40  ;;  %v1840_v44 = vld [vmem:[%s2523_s13 + $0xa4] sm:$0xf]  ;;  %v1625_v45 = vld [vmem:[%s2523_s13 + $0xb0] sm:$0xf0]  ;;  %v1631_v46 = vld [vmem:[%s2523_s13 + $0xa8] sm:$0xf]  ;;  %v1624_v47 = vor.u32 %v1842_v42, %v1623_v41 }
 0x101   : > { %832 = vmatpush.bf16.msra.mxu0 %v1640_v34  ;;  %v1843_v48 = vld [vmem:[%s2523_s13 + $0xb4] sm:$0xf0]  ;;  %v1841_v49 = vld [vmem:[%s2523_s13 + $0xac] sm:$0xf]  ;;  %v1633_v50 = vld [vmem:[%s2523_s13 + $0xb8] sm:$0xf0]  ;;  %v1628_v51 = vor.u32 %v1840_v44, %v1625_v45 }
 0x102   : > { %846 = vmatpush.bf16.msra.mxu1 %v1644_v35  ;;  %860 = vmatpush.bf16.msra.mxu2 %v1648_v39  ;;  %v1632_v52 = vor.u32 %v1843_v48, %v1631_v46  ;;  %v1607_v53 = vld [vmem:[%s2523_s13 + $0x80] sm:$0xf]  ;;  %v1838_v54 = vld [vmem:[%s2523_s13 + $0x8c] sm:$0xf0]  ;;  %v1836_v55 = vld [vmem:[%s2523_s13 + $0x84] sm:$0xf]  ;;  %v1636_v56 = vor.u32 %v1841_v49, %v1633_v50 }
 0x103   : > { %874 = vmatpush.bf16.msra.mxu3 %v1652_v43  ;;  %v1609_v57 = vld [vmem:[%s2523_s13 + $0x90] sm:$0xf0]  ;;  %v1615_v58 = vld [vmem:[%s2523_s13 + $0x88] sm:$0xf]  ;;  %v1839_v59 = vld [vmem:[%s2523_s13 + $0x94] sm:$0xf0]  ;;  %v1608_v62 = vor.u32 %v1838_v54, %v1607_v53 }
 0x104   : > { %v1837_v60 = vld [vmem:[%s2523_s13 + $0x8c] sm:$0xf]  ;;  %v1617_v61 = vld [vmem:[%s2523_s13 + $0x98] sm:$0xf0]  ;;  %v1612_v63 = vor.u32 %v1836_v55, %v1609_v57  ;;  %v1616_v0 = vor.u32 %v1839_v59, %v1615_v58  ;;  %v1591_v1 = vld [vmem:[%s2523_s13 + $0x60] sm:$0xf] }
 0x105   : > { %833 = vmatpush.bf16.msra.mxu0 %v1624_v47  ;;  %v1834_v2 = vld [vmem:[%s2523_s13 + $0x6c] sm:$0xf0]  ;;  %v1832_v3 = vld [vmem:[%s2523_s13 + $0x64] sm:$0xf]  ;;  %v1620_v4 = vor.u32 %v1837_v60, %v1617_v61  ;;  %v1593_v5 = vld [vmem:[%s2523_s13 + $0x70] sm:$0xf0] }
 0x106   : > { %847 = vmatpush.bf16.msra.mxu1 %v1628_v51  ;;  %861 = vmatpush.bf16.msra.mxu2 %v1632_v52  ;;  %v1599_v6 = vld [vmem:[%s2523_s13 + $0x68] sm:$0xf]  ;;  %v1835_v7 = vld [vmem:[%s2523_s13 + $0x74] sm:$0xf0]  ;;  %v1833_v8 = vld [vmem:[%s2523_s13 + $0x6c] sm:$0xf]  ;;  %v1592_v10 = vor.u32 %v1834_v2, %v1591_v1  ;;  %v1596_v11 = vor.u32 %v1832_v3, %v1593_v5 }
 0x107   : > { %875 = vmatpush.bf16.msra.mxu3 %v1636_v56  ;;  %v1601_v9 = vld [vmem:[%s2523_s13 + $0x78] sm:$0xf0]  ;;  %v1600_v12 = vor.u32 %v1835_v7, %v1599_v6  ;;  %v1575_v13 = vld [vmem:[%s2523_s13 + $0x40] sm:$0xf]  ;;  %v1830_v14 = vld [vmem:[%s2523_s13 + $0x4c] sm:$0xf0] }
 0x108   : > { %v1828_v15 = vld [vmem:[%s2523_s13 + $0x44] sm:$0xf]  ;;  %v1604_v16 = vor.u32 %v1833_v8, %v1601_v9  ;;  %v1577_v17 = vld [vmem:[%s2523_s13 + $0x50] sm:$0xf0]  ;;  %v1583_v18 = vld [vmem:[%s2523_s13 + $0x48] sm:$0xf]  ;;  %v1576_v22 = vor.u32 %v1830_v14, %v1575_v13 }
 0x109   : > { %834 = vmatpush.bf16.msra.mxu0 %v1608_v62  ;;  %v1831_v19 = vld [vmem:[%s2523_s13 + $0x54] sm:$0xf0]  ;;  %v1829_v20 = vld [vmem:[%s2523_s13 + $0x4c] sm:$0xf]  ;;  %v1585_v21 = vld [vmem:[%s2523_s13 + $0x58] sm:$0xf0]  ;;  %v1580_v23 = vor.u32 %v1828_v15, %v1577_v17 }
 0x10a   : > { %848 = vmatpush.bf16.msra.mxu1 %v1612_v63  ;;  %862 = vmatpush.bf16.msra.mxu2 %v1616_v0  ;;  %v1584_v24 = vor.u32 %v1831_v19, %v1583_v18  ;;  %v1559_v25 = vld [vmem:[%s2523_s13 + $0x20] sm:$0xf]  ;;  %v1826_v26 = vld [vmem:[%s2523_s13 + $0x2c] sm:$0xf0]  ;;  %v1824_v27 = vld [vmem:[%s2523_s13 + $0x24] sm:$0xf]  ;;  %v1588_v28 = vor.u32 %v1829_v20, %v1585_v21 }
 0x10b   : > { %876 = vmatpush.bf16.msra.mxu3 %v1620_v4  ;;  %v1561_v29 = vld [vmem:[%s2523_s13 + $0x30] sm:$0xf0]  ;;  %v1567_v30 = vld [vmem:[%s2523_s13 + $0x28] sm:$0xf]  ;;  %v1827_v31 = vld [vmem:[%s2523_s13 + $0x34] sm:$0xf0]  ;;  %v1560_v34 = vor.u32 %v1826_v26, %v1559_v25 }
 0x10c   : > { %v1825_v32 = vld [vmem:[%s2523_s13 + $0x2c] sm:$0xf]  ;;  %v1569_v33 = vld [vmem:[%s2523_s13 + $0x38] sm:$0xf0]  ;;  %v1564_v35 = vor.u32 %v1824_v27, %v1561_v29  ;;  %v1568_v36 = vor.u32 %v1827_v31, %v1567_v30  ;;  %v1543_v37 = vld [vmem:[%s2523_s13] sm:$0xf] }
 0x10d   : > { %835 = vmatpush.bf16.msra.mxu0 %v1592_v10  ;;  %v1822_v38 = vld [vmem:[%s2523_s13 + $0xc] sm:$0xf0]  ;;  %v1820_v39 = vld [vmem:[%s2523_s13 + $0x4] sm:$0xf]  ;;  %v1572_v40 = vor.u32 %v1825_v32, %v1569_v33  ;;  %v1545_v41 = vld [vmem:[%s2523_s13 + $0x10] sm:$0xf0] }
 0x10e   : > { %849 = vmatpush.bf16.msra.mxu1 %v1596_v11  ;;  %863 = vmatpush.bf16.msra.mxu2 %v1600_v12  ;;  %v1551_v42 = vld [vmem:[%s2523_s13 + $0x8] sm:$0xf]  ;;  %v1823_v43 = vld [vmem:[%s2523_s13 + $0x14] sm:$0xf0]  ;;  %v1821_v44 = vld [vmem:[%s2523_s13 + $0xc] sm:$0xf]  ;;  %v1544_v46 = vor.u32 %v1822_v38, %v1543_v37  ;;  %v1548_v47 = vor.u32 %v1820_v39, %v1545_v41 }
 0x10f   : > { %877 = vmatpush.bf16.msra.mxu3 %v1604_v16  ;;  %v1553_v45 = vld [vmem:[%s2523_s13 + $0x18] sm:$0xf0]  ;;  %v1552_v48 = vor.u32 %v1823_v43, %v1551_v42  ;;  %v1859_v50 = vld [vmem:[%s2533_s22 + $0x38] sm:$0xff]  ;;  %v1857_v58 = vld [vmem:[%s2533_s22 + $0x28] sm:$0xff]  ;;  %p1797_p7 = scmp.ne.s32.totalorder %s2285_s18, 1 }
 0x110   : > { %v1556_v49 = vor.u32 %v1821_v44, %v1553_v45  ;;  %v1819_v51 = vld [vmem:[#allocation2] sm:$0xff]  ;;  %v1858_v54 = vld [vmem:[%s2533_s22 + $0x30] sm:$0xff]  ;;  %v1865_v60 = vld [vmem:[%s2533_s22 + $0x68] sm:$0xff]  ;;  %s2749_s3 = sld [smem:[#allocation30_spill]] (!%p1797_p7) }
 0x111   : > { %836 = vmatpush.bf16.msra.mxu0 %v1576_v22  ;;  %v1867_v52 = vld [vmem:[%s2533_s22 + $0x78] sm:$0xff]  ;;  %v1866_v56 = vld [vmem:[%s2533_s22 + $0x70] sm:$0xff]  ;;  %v1856_v61 = vld [vmem:[%s2533_s22 + $0x20] sm:$0xff]  ;;  %s1249_s23 = sld [smem:[#allocation4]] (!%p1797_p7) }
 0x112   : > { %850 = vmatpush.bf16.msra.mxu1 %v1580_v23  ;;  %864 = vmatpush.bf16.msra.mxu2 %v1584_v24  ;;  %v1875_v53 = vld [vmem:[%s2533_s22 + $0xb8] sm:$0xff]  ;;  %v1874_v57 = vld [vmem:[%s2533_s22 + $0xb0] sm:$0xff]  ;;  %v1864_v62 = vld [vmem:[%s2533_s22 + $0x60] sm:$0xff] }
 0x113   : > { %878 = vmatpush.bf16.msra.mxu3 %v1588_v28  ;;  %v1883_v55 = vld [vmem:[%s2533_s22 + $0xf8] sm:$0xff]  ;;  %v1882_v59 = vld [vmem:[%s2533_s22 + $0xf0] sm:$0xff]  ;;  %v1873_v63 = vld [vmem:[%s2533_s22 + $0xa8] sm:$0xff] }
 0x114   : > { %v1881_v0 = vld [vmem:[%s2533_s22 + $0xe8] sm:$0xff]  ;;  %v1855_v1 = vld [vmem:[%s2533_s22 + $0x18] sm:$0xff]  ;;  %v1872_v3 = vld [vmem:[%s2533_s22 + $0xa0] sm:$0xff] }
 0x115   : > { %837 = vmatpush.bf16.msra.mxu0 %v1560_v34  ;;  %v1863_v2 = vld [vmem:[%s2533_s22 + $0x58] sm:$0xff]  ;;  %v1880_v4 = vld [vmem:[%s2533_s22 + $0xe0] sm:$0xff]  ;;  %v1854_v5 = vld [vmem:[%s2533_s22 + $0x10] sm:$0xff] }
 0x116   : > { %851 = vmatpush.bf16.msra.mxu1 %v1564_v35  ;;  %865 = vmatpush.bf16.msra.mxu2 %v1568_v36  ;;  %v1862_v6 = vld [vmem:[%s2533_s22 + $0x50] sm:$0xff]  ;;  %v1871_v7 = vld [vmem:[%s2533_s22 + $0x98] sm:$0xff]  ;;  %v1853_v9 = vld [vmem:[%s2533_s22 + $0x8] sm:$0xff] }
 0x117   : > { %879 = vmatpush.bf16.msra.mxu3 %v1572_v40  ;;  %v1879_v8 = vld [vmem:[%s2533_s22 + $0xd8] sm:$0xff]  ;;  %v1861_v10 = vld [vmem:[%s2533_s22 + $0x48] sm:$0xff]  ;;  %v1870_v11 = vld [vmem:[%s2533_s22 + $0x90] sm:$0xff] }
 0x118   : > { %v1878_v12 = vld [vmem:[%s2533_s22 + $0xd0] sm:$0xff]  ;;  %v1852_v13 = vld [vmem:[%s2533_s22] sm:$0xff]  ;;  %v1869_v15 = vld [vmem:[%s2533_s22 + $0x88] sm:$0xff] }
 0x119   : > { %838 = vmatpush.bf16.msra.mxu0 %v1544_v46  ;;  %v1860_v14 = vld [vmem:[%s2533_s22 + $0x40] sm:$0xff]  ;;  %v1877_v16 = vld [vmem:[%s2533_s22 + $0xc8] sm:$0xff]  ;;  %v655_v19 = vld [vmem:[%s2531_s27] sm:$0xf] }
 0x11a   : > { %852 = vmatpush.bf16.msra.mxu1 %v1548_v47  ;;  %866 = vmatpush.bf16.msra.mxu2 %v1552_v48  ;;  %v1868_v17 = vld [vmem:[%s2533_s22 + $0x80] sm:$0xff]  ;;  %v657_v20 = vperm.slane %v655_v19, 0  ;;  %v658_v21 = vperm.slane %v655_v19, 1  ;;  %v659_v26 = vperm.slane %v655_v19, 2  ;;  %v660_v27 = vperm.slane %v655_v19, 3 }
 0x11b   : > { %880 = vmatpush.bf16.msra.mxu3 %v1556_v49  ;;  %v1876_v18 = vld [vmem:[%s2533_s22 + $0xc0] sm:$0xff] }
 0x11c   : > { %839 = vmatmul.bf16.vlgmr.msra.gmra.mxu0 %v1819_v51 }
 0x11d   : > { %1165 = vmatpush.bf16.msrb.mxu0 %v1859_v50  ;;  %853 = vmatmul.bf16.vlgmr.msra.gmra.mxu1 %v1819_v51 }
 0x11e   : > { %1179 = vmatpush.bf16.msrb.mxu1 %v1867_v52  ;;  %867 = vmatmul.bf16.vlgmr.msra.gmra.mxu2 %v1819_v51 }
 0x11f   : > { %881 = vmatmul.bf16.vlgmr.msra.gmra.mxu3 %v1819_v51  ;;  %1193 = vmatpush.bf16.msrb.mxu2 %v1875_v53 }
 0x120   : > { %1207 = vmatpush.bf16.msrb.mxu3 %v1883_v55 }
 0x121   : > { %1166 = vmatpush.bf16.msrb.mxu0 %v1858_v54 }
 0x122   : > { %1180 = vmatpush.bf16.msrb.mxu1 %v1866_v56 }
 0x123   : > { %1194 = vmatpush.bf16.msrb.mxu2 %v1874_v57 }
 0x124   : > { %1208 = vmatpush.bf16.msrb.mxu3 %v1882_v59 }
 0x125   : > { %1167 = vmatpush.bf16.msrb.mxu0 %v1857_v58  ;;  %v903_v58 = vld [vmem:[#allocation3] sm:$0xff] }
 0x126   : > { %1181 = vmatpush.bf16.msrb.mxu1 %v1865_v60 }
 0x127   : > { %1195 = vmatpush.bf16.msrb.mxu2 %v1873_v63 }
 0x128   : > { %1209 = vmatpush.bf16.msrb.mxu3 %v1881_v0 }
 0x129   : > { %1168 = vmatpush.bf16.msrb.mxu0 %v1856_v61 }
 0x12a   : > { %1182 = vmatpush.bf16.msrb.mxu1 %v1864_v62 }
 0x12b   : > { %1196 = vmatpush.bf16.msrb.mxu2 %v1872_v3 }
 0x12c   : > { %1210 = vmatpush.bf16.msrb.mxu3 %v1880_v4 }
 0x12d   : > { %1169 = vmatpush.bf16.msrb.mxu0 %v1855_v1 }
 0x12e   : > { %1183 = vmatpush.bf16.msrb.mxu1 %v1863_v2  ;;  %v904_v2 = vld [vmem:[#allocation3 + $0x8] sm:$0xff] }
 0x12f   : > { %1197 = vmatpush.bf16.msrb.mxu2 %v1871_v7 }
 0x130   : > { %1211 = vmatpush.bf16.msrb.mxu3 %v1879_v8 }
 0x131   : > { %1170 = vmatpush.bf16.msrb.mxu0 %v1854_v5 }
 0x132   : > { %1184 = vmatpush.bf16.msrb.mxu1 %v1862_v6 }
 0x133   : > { %1198 = vmatpush.bf16.msrb.mxu2 %v1870_v11 }
 0x134   : > { %1212 = vmatpush.bf16.msrb.mxu3 %v1878_v12 }
 0x135   : > { %1171 = vmatpush.bf16.msrb.mxu0 %v1853_v9 }
 0x136   : > { %1185 = vmatpush.bf16.msrb.mxu1 %v1861_v10 }
 0x137   : > { %1199 = vmatpush.bf16.msrb.mxu2 %v1869_v15 }
 0x138   : > { %1213 = vmatpush.bf16.msrb.mxu3 %v1877_v16 }
 0x139   : > { %1172 = vmatpush.bf16.msrb.mxu0 %v1852_v13 }
 0x13a   : > { %1186 = vmatpush.bf16.msrb.mxu1 %v1860_v14 }
 0x13b   : > { %1200 = vmatpush.bf16.msrb.mxu2 %v1868_v17 }
 0x13c   : > { %1214 = vmatpush.bf16.msrb.mxu3 %v1876_v18 }
 0x199   : > { %v840_v22 = vpop.f32.mrf.mxu0 }
 0x19a   : > { %v841_v23 = vadd.f32 %v840_v22, %v657_v20  ;;  %v854_v24 = vpop.f32.mrf.mxu1 }
 0x19b   : > { %v855_v25 = vadd.f32 %v854_v24, %v658_v21 }
 0x19c   : > { %2003 = vtanh.f32 %v841_v23 }
 0x19d   : > { %2005 = vtanh.f32 %v855_v25 }
 0x1a1   : > { %v868_v28 = vpop.f32.mrf.mxu2  ;;  %v842_v31 = vpop.f32.mrf.mxu0 }
 0x1a2   : > { %v869_v29 = vadd.f32 %v868_v28, %v659_v26  ;;  %v882_v30 = vpop.f32.mrf.mxu3  ;;  %v2004_v32 = vpop.eup %2003  ;;  %v843_v34 = vadd.f32 %v842_v31, %v657_v20 }
 0x1a3   : > { %v883_v33 = vadd.f32 %v882_v30, %v660_v27  ;;  %v856_v35 = vpop.f32.mrf.mxu1  ;;  %v2006_v36 = vpop.eup %2005  ;;  %895 = vst [vmem:[%s2535_s14] sm:$0xff] %v2004_v32 }
 0x1a4   : > { %2007 = vtanh.f32 %v869_v29  ;;  %v857_v37 = vadd.f32 %v856_v35, %v658_v21  ;;  %896 = vst [vmem:[%s2535_s14 + $0x8] sm:$0xff] %v2006_v36 }
 0x1a5   : > { %2009 = vtanh.f32 %v883_v33 }
 0x1a6   : > { %2011 = vtanh.f32 %v843_v34 }
 0x1a7   : > { %2013 = vtanh.f32 %v857_v37 }
 0x1a9   : > { %v870_v38 = vpop.f32.mrf.mxu2 }
 0x1aa   : > { %v2008_v39 = vpop.eup %2007  ;;  %v871_v40 = vadd.f32 %v870_v38, %v659_v26  ;;  %v884_v41 = vpop.f32.mrf.mxu3 }
 0x1ab   : > { %v2010_v42 = vpop.eup %2009  ;;  %897 = vst [vmem:[%s2535_s14 + $0x10] sm:$0xff] %v2008_v39  ;;  %v885_v43 = vadd.f32 %v884_v41, %v660_v27 }
 0x1ac   : > { %v2012_v44 = vpop.eup %2011  ;;  %898 = vst [vmem:[%s2535_s14 + $0x18] sm:$0xff] %v2010_v42  ;;  %2015 = vtanh.f32 %v871_v40 }
 0x1ad   : > { %v2014_v45 = vpop.eup %2013  ;;  %899 = vst [vmem:[%s2535_s14 + $0x20] sm:$0xff] %v2012_v44  ;;  %2017 = vtanh.f32 %v885_v43  ;;  %v905_v46 = vpack.c.bf16 %v2012_v44, %v2004_v32 }
 0x1ae   : > { %900 = vst [vmem:[%s2535_s14 + $0x28] sm:$0xff] %v2014_v45  ;;  %v906_v47 = vpack.c.bf16 %v2014_v45, %v2006_v36 }
 0x1af   : > { %1173 = vmatmul.bf16.vlgmr.msrb.gmra.mxu0 %v905_v46 }
 0x1b0   : > { %1187 = vmatmul.bf16.vlgmr.msrb.gmra.mxu1 %v906_v47 }
 0x1b2   : > { %v2016_v48 = vpop.eup %2015 }
 0x1b3   : > { %v2018_v49 = vpop.eup %2017  ;;  %901 = vst [vmem:[%s2535_s14 + $0x30] sm:$0xff] %v2016_v48  ;;  %v907_v50 = vpack.c.bf16 %v2016_v48, %v2008_v39 }
 0x1b4   : > { %902 = vst [vmem:[%s2535_s14 + $0x38] sm:$0xff] %v2018_v49  ;;  %v908_v51 = vpack.c.bf16 %v2018_v49, %v2010_v42 }
 0x1b5   : > { %1201 = vmatmul.bf16.vlgmr.msrb.gmra.mxu2 %v907_v50 }
 0x1b6   : > { %1215 = vmatmul.bf16.vlgmr.msrb.gmra.mxu3 %v908_v51 }
 0x22c   : > { %v1174_v52 = vpop.f32.mrf.mxu0 }
 0x22d   : > { %v1188_v53 = vpop.f32.mrf.mxu1 }
 0x22e   : > { %v1189_v54 = vadd.f32 %v1188_v53, %v1174_v52 }
 0x234   : > { %v1176_v60 = vpop.f32.mrf.mxu0 }
 0x235   : > { %v1190_v61 = vpop.f32.mrf.mxu1 }
 0x236   : > { %v1191_v63 = vadd.f32 %v1190_v61, %v1176_v60 }
 0x238   : > { %v1202_v55 = vpop.f32.mrf.mxu2 }
 0x239   : > { %v1203_v56 = vadd.f32 %v1202_v55, %v1189_v54  ;;  %v1216_v57 = vpop.f32.mrf.mxu3 }
 0x23b   : > { %v1217_v59 = vadd.f32 %v1216_v57, %v1203_v56 }
 0x23d   : > { %v1221_v62 = vadd.f32 %v1217_v59, %v903_v58 }
 0x23f   : > { %1223 = vst [vmem:[#allocation3] sm:$0xff] %v1221_v62 }
 0x240   : > { %v1204_v0 = vpop.f32.mrf.mxu2 }
 0x241   : > { %v1205_v1 = vadd.f32 %v1204_v0, %v1191_v63  ;;  %v1218_v3 = vpop.f32.mrf.mxu3 }
 0x243   : > { %v1219_v4 = vadd.f32 %v1218_v3, %v1205_v1  ;;  %1228 = sbr.rel (%p1797_p7) target bundleno = 906 (0x38a), region = 84 }
 0x245   : > { %v1222_v5 = vadd.f32 %v1219_v4, %v904_v2 }
 0x247   : > { %1224 = vst [vmem:[#allocation3 + $0x8] sm:$0xff] %v1222_v5 }
 0x248   : > { %v1229_v6 = vld [vmem:[#allocation3] sm:$0xff]  ;;  %v2019_v7 = vld [vmem:[%s2707_s6] ss:$0 sm:$0xff]  ;;  %v1250_v16 = vstv %s1249_s23  ;;  %v1253_v17 = vlaneseq  ;;  %v2303_v25 = vmov 0.0   ;;  %vm1272_vm1 = vcmask 7168  }
 0x249   : > { %v1235_v9 = vadd.f32 %v2019_v7, %v1229_v6  ;;  %v2020_v10 = vld [vmem:[%s2749_s3] ss:$0 sm:$0xff] }
 0x24a   : > { %v1254_v20 = vshrl.u32 %v1253_v17, 7 }
 0x24b   : > { %v1237_v11 = vmax.f32 %v1235_v9, 0.0 }
 0x24c   : > { %vm1260_vm0 = vcmp.lt.s32.totalorder %v1254_v20, 2 }
 0x24d   : > { %v1243_v13 = vmul.f32 %v2020_v10, %v1237_v11  ;;  %v1798_v26 = vsel %vm1260_vm0, 1.0, %v2303_v25 }
 0x24e   : > { %v1230_v8 = vld [vmem:[#allocation3 + $0x8] sm:$0xff] }
 0x24f   : > { %v1236_v12 = vadd.f32 %v2019_v7, %v1230_v8  ;;  %1245 = vadd.xlane.f32.xlu0 %v1243_v13 }
 0x251   : > { %v1238_v14 = vmax.f32 %v1236_v12, 0.0 }
 0x253   : > { %v1244_v15 = vmul.f32 %v2020_v10, %v1238_v14 }
 0x257   : > { %1247 = vadd.xlane.f32.xlu0 %v1244_v15 }
 0x2c2   : > { %v1246_v18 = vpop.xlane.xlu0 %1245 }
 0x2c3   : > { %v1251_v19 = vadd.f32 %v1250_v16, %v1246_v18 }
 0x2c5   : > { %v1799_v21 = vadd.f32 -1.0, %v1251_v19 }
 0x2c7   : > { %v1268_v23 = vmul.f32 %v1799_v21, %v1799_v21 }
 0x2c9   : > { %v1270_v29 = vmul.f32 %v1798_v26, %v1268_v23 }
 0x2ca   : > { %v1248_v22 = vpop.xlane.xlu0 %1247 }
 0x2cb   : > { %v1252_v24 = vadd.f32 %v1250_v16, %v1248_v22  ;;  %v1273_v31 = vsel %vm1272_vm1, %v1270_v29, 0.0 }
 0x2cd   : > { %v1800_v27 = vadd.f32 -1.0, %v1252_v24 }
 0x2cf   : > { %v1269_v28 = vmul.f32 %v1800_v27, %v1800_v27 }
 0x2d1   : > { %v1271_v30 = vmul.f32 0.0, %v1269_v28 }
 0x2d3   : > { %v1274_v32 = vsel %vm1272_vm1, %v1271_v30, 0.0 }
 0x2d4   : > { %v1275_v33 = vadd.f32 %v1274_v32, %v1273_v31 }
 0x2d6   : > { %1276 = vadd.xlane.f32.xlu1 %v1275_v33 }
 0x349   : > { %v1277_v34 = vpop.xlane.xlu1 %1276 }
 0x34a   : > { %v1278_v35 = vrot.slane %v1277_v34, 4 }
 0x34c   : > { %v1279_v36 = vadd.f32 %v1278_v35, %v1277_v34 }
 0x34e   : > { %v1280_v37 = vrot.slane %v1279_v36, 2 }
 0x350   : > { %v1281_v38 = vadd.f32 %v1280_v37, %v1279_v36 }
 0x352   : > { %v1282_v39 = vrot.slane %v1281_v38, 1 }
 0x354   : > { %v1283_v40 = vadd.f32 %v1282_v39, %v1281_v38 }
 0x356   : > { %1890 = vpush %v1283_v40 }
 0x387   : > { %s1891_s10 = spop %1890 }
 0x388   : > { %v1285_v41 = vstv %s1891_s10 }
 0x389   : > { %1286 = vst [vmem:[#allocation14] sm:$0xff] %v1285_v41 }
 0x38a PF: > { %s1884_s29 = sshll.u32 %s2285_s18, 5  ;;  %s2751_s17 = sld [smem:[#allocation31_spill]] }
 0x38b   : > { %s1303_s21 = sshll.u32 %s2535_s14, 4  ;;  %s1288_s27 = scalar_lea.sflag [#allocation7], %s2520_s7  ;;  %s1304_s21 = int_to_ptr.vmem [resolvable:$true] %s1303_s21 }
 0x390   : > { %s2752_s30 = smov %s2751_s17  ;;  %s1302_s13 = scalar_lea.hbm %s2751_s17, %s1884_s29 }
 0x391   : > { %s1305_s11 = sshll.u32 %s1302_s13, 4  ;;  %s2191_s18 = scalar_lea.hbm %s2752_s30, 128  ;;  %s1306_s11 = int_to_ptr.hbm [resolvable:$true] %s1305_s11 }
 0x392   : > { %s2185_s22 = sshra.s32 %s1306_s11, 4  ;;  %s2186_s22 = int_to_ptr.hbm [resolvable:$true] %s2185_s22 }
 0x393   : > { %s2187_s24 = scalar_lea.hbm %s2186_s22, 64  ;;  %p2192_p1 = scmp.lt.s32.totalorder %s2186_s22, %s2752_s30 }
 0x394   : > { %p2188_p11 = scmp.ne.s32.totalorder %s2186_s22, %s2187_s24  ;;  %p2193_p2 = scmp.lt.s32.totalorder %s2191_s18, %s2187_s24 }
 0x396   : > { %p2189_p12 = pnand %p2188_p11, %p2420_p8  ;;  %p2194_p6 = por %p2193_p2, %p2192_p1 }
 0x398   : > { %p2190_p13 = pneg %p2189_p12 }
 0x39a   : > { %p2195_p10 = pnand %p2194_p6, %p2190_p13 }
 0x39c   : > { %2198 = shalt.err (!%p2195_p10)
}
 0x39d   : > { %s2304_s7 = smov 512   ;;  %s2305_s14 = smov 1024  }
 0x39e   : > { %s2306_s25 = smov 32   ;;  %s2307_s3 = smov [#allocation14]  }
 0x39f   : > { %1906 = dma.vmem_to_hbm [thread:$0]  (%p2420_p8), %s1304_s21, 1024, %s1306_s11, %s1288_s27, %s2304_s7, %s2305_s14, %s2306_s25  }
 0x3a0   : > { %s1320_s23 = sshll.u32 %s2307_s3, 4  ;;  %s2753_s28 = sld [smem:[#allocation32_spill]]  ;;  %s1321_s23 = int_to_ptr.vmem [resolvable:$true] %s1320_s23 }
 0x3a6   : > { %s1322_s0 = sshll.u32 %s2753_s28, 4  ;;  %s1323_s0 = int_to_ptr.hbm [resolvable:$true] %s1322_s0 }
 0x3a7   : > { %1908 = dma.vmem_to_hbm [thread:$0]  (%p269_p4), %s1321_s23, 128, %s1323_s0, [#allocation15]  }
 0x3a8   : > { %2264 = dma.done.wait (%p269_p4), [#allocation15], 128  }
 0x3a9   : > { %2266 = vsyncadd (%p269_p4), [#allocation15], 4294967168 }
 0x3aa PF: > { %s2754_s17 = sld [smem:[#allocation21_spill]]  ;;  %p1930_p8 = pnand %p1484_p0, %p2424_p9 }
 0x3ab   : > { %s2756_s15 = sld [smem:[#allocation23_spill]] }
 0x3ac   : > { %p1931_p5 = pneg %p1930_p8 }
 0x3b0   : > { %s1339_s21 = sand.u32 1, %s2754_s17  }
 0x3b1   : > { %s1340_s11 = scalar_lea.sflag [#allocation7], %s1339_s21 }
 0x3b2   : > { %2268 = dma.done.wait (%p1931_p5), %s1340_s11, 1024  }
 0x3b3   : > { %2270 = vsyncadd (%p1931_p5), %s1340_s11, 4294966272  ;;  %s28_s20 = sadd.s32 1, %s2756_s15   ;;  %s2757_s27 = sld [smem:[#allocation22_spill]] }
 0x3b4   : > { %p25_p3 = scmp.ge.s32.totalorder %s28_s20, 4   ;;  %s2758_s17 = sld [smem:[#allocation27_spill]] }
 0x3b5   : > { %s2759_s8 = sld [smem:[#allocation26_spill]]  ;;  %s2760_s15 = smov %s2277_s16 }
 0x3b6   : > { %s2762_s18 = smov %s2289_s19 }
 0x3b7   :  { %27 = sbr.rel (!%p25_p3) target bundleno = 14 (0xe), region = 148 }
 0x3b9   : > { %s2761_s16 = smov %s2757_s27 }
 0x3bb   : > { %s2763_s19 = smov %s2759_s8 }
 0x3bc   :  { %1346 = vsyncpa [#allocation6], 1 }
 0x3bd   :  { %1348 = vsyncpa [#allocation6 + $0x1], 1 }
 0x3be   :  { %1349 = vsyncpa [#allocation9], 1 }
 0x3bf   :  { %1350 = vsyncpa [#allocation7], 1 }
 0x3c0   :  { %1352 = vsyncpa [#allocation7 + $0x1], 1 }
 0x3c1   :  { %1353 = vsyncpa [#allocation15], 1 }

</bundles_post_ra>
